<compile_context>
chip_gen: v5e
topology: v5e:2x2
jax: 0.10.0
libtpu: 0.0.40
codegen_flags: <defaults>
</compile_context>

<pallas_src>
import functools

import jax
import jax.numpy as jnp
from jax.experimental import pallas as pl
from jax.experimental.pallas import tpu as pltpu


def _round_up(x, m):
    return ((x + m - 1) // m) * m


def _choose_tile(dim_pad, cap, unit=128):
    """Largest multiple of `unit` that divides `dim_pad` and is <= cap."""
    m = dim_pad // unit
    best = 1
    for d in range(1, m + 1):
        if m % d == 0 and d * unit <= cap:
            best = d
    return best * unit


def _split_for_parallel(dim_pad, tile):
    """Prefer >=2 tiles along a 'parallel' grid axis (v7x megacore)."""
    if dim_pad // tile >= 2 or tile <= 128:
        return tile
    smaller = _choose_tile(dim_pad, tile // 2)
    return smaller if dim_pad // smaller >= 2 else tile


def _pad2(x, rows, cols):
    pr, pc_ = rows - x.shape[0], cols - x.shape[1]
    if pr == 0 and pc_ == 0:
        return x
    return jnp.pad(x, ((0, pr), (0, pc_)))


def _vmem_limit_bytes():
    # ~3/4 of physical VMEM, capped: -> 96 MiB on v5e/v6e (128 MiB phys),
    # 48 MiB on v7x (64 MiB phys).  Falls back to 48 MiB if the query fails.
    try:
        cap = int(pltpu.get_tpu_info().vmem_capacity_bytes)
        return max(32 << 20, min((cap * 3) // 4, 96 << 20))
    except Exception:
        return 48 << 20


# ---------------------------------------------------------------------------
# Stage 1: feats = vInfo @ vertMask     (C_pad, V_pad) @ (V_pad, P_pad)
# ---------------------------------------------------------------------------
def _feats_kernel(vinfo_ref, vmask_ref, out_ref, *, vinfo_resident):
    k = pl.program_id(1)

    @pl.when(k == 0)
    def _():
        out_ref[...] = jnp.zeros_like(out_ref)

    # vinfo_ref is (n_k, C_pad, tk) resident, or (1, C_pad, tk) per-step.
    a = vinfo_ref[k] if vinfo_resident else vinfo_ref[0]           # (C_pad, tk)
    out_ref[...] += jnp.dot(a, vmask_ref[...],
                            preferred_element_type=jnp.float32)


def _feats_matmul(vinfo_3d, vmask_p, *, tk, tp, vinfo_resident, vmem_limit):
    n_k, C_pad, _ = vinfo_3d.shape
    V_pad, P_pad = vmask_p.shape
    cost = pl.CostEstimate(
        flops=2 * C_pad * V_pad * P_pad,
        transcendentals=0,
        bytes_accessed=int(vinfo_3d.size) * vinfo_3d.dtype.itemsize
        + int(vmask_p.size) * vmask_p.dtype.itemsize
        + 4 * C_pad * P_pad,
    )
    if vinfo_resident:
        vinfo_spec = pl.BlockSpec((n_k, C_pad, tk), lambda p, k: (0, 0, 0))
    else:
        vinfo_spec = pl.BlockSpec((1, C_pad, tk), lambda p, k: (k, 0, 0))
    return pl.pallas_call(
        functools.partial(_feats_kernel, vinfo_resident=vinfo_resident),
        out_shape=jax.ShapeDtypeStruct((C_pad, P_pad), jnp.float32),
        grid=(P_pad // tp, n_k),
        in_specs=[vinfo_spec,
                  pl.BlockSpec((tk, tp), lambda p, k: (k, p))],
        out_specs=pl.BlockSpec((C_pad, tp), lambda p, k: (0, p)),
        compiler_params=pltpu.CompilerParams(
            dimension_semantics=("parallel", "arbitrary"),
            vmem_limit_bytes=vmem_limit),
        cost_estimate=cost,
    )(vinfo_3d, vmask_p)


# ---------------------------------------------------------------------------
# Stage 2: windowed one-hot-matmul scatter -> lane-dense (C_pad, HW_pad)
# ---------------------------------------------------------------------------
def _scatter_kernel(chunk_of_ref, nch_ref, pix_ref, feats_ref, out_ref):
    j = pl.program_id(0)      # HW tile
    c = pl.program_id(1)      # chunk of the sorted-pixel window for this tile

    @pl.when(c == 0)
    def _():
        out_ref[...] = jnp.zeros_like(out_ref)

    @pl.when(c < nch_ref[j])
    def _():
        t_hw = out_ref.shape[1]
        pc = feats_ref.shape[1]
        # Row m of this HW tile is flat pixel j*t_hw + m.  Shift the tile
        # offset onto pix (a (1, pc) op) so the iota is j-invariant.
        row_ids = jax.lax.broadcasted_iota(jnp.int32, (t_hw, pc), 0)
        pix_local = pix_ref[...] - j * t_hw                        # (1, pc)
        sel = (row_ids == pix_local).astype(feats_ref.dtype)       # (t_hw, pc)
        out_ref[...] += jax.lax.dot_general(
            feats_ref[...], sel,
            dimension_numbers=(((1,), (1,)), ((), ())),            # feats @ sel.T
            preferred_element_type=jnp.float32,
        )


def _scatter_windowed(chunk_of, nch, pix_p, feats_s, *, t_hw, pc, hw_pad,
                      max_chunks, vmem_limit):
    C_pad, P_pad = feats_s.shape
    n_hw = hw_pad // t_hw

    def chunk_map(j, c, chunk_of_ref, nch_ref):
        return (0, chunk_of_ref[j * max_chunks + c])

    def out_map(j, c, chunk_of_ref, nch_ref):
        return (0, j)

    cost = pl.CostEstimate(
        flops=2 * C_pad * pc * t_hw * max_chunks * n_hw,
        transcendentals=0,
        bytes_accessed=n_hw * max_chunks
        * (C_pad * pc * feats_s.dtype.itemsize + 4 * pc)
        + 4 * C_pad * hw_pad,
    )
    return pl.pallas_call(
        _scatter_kernel,
        out_shape=jax.ShapeDtypeStruct((C_pad, hw_pad), jnp.float32),
        grid_spec=pltpu.PrefetchScalarGridSpec(
            num_scalar_prefetch=2,
            grid=(n_hw, max_chunks),
            in_specs=[pl.BlockSpec((1, pc), chunk_map),
                      pl.BlockSpec((C_pad, pc), chunk_map)],
            out_specs=pl.BlockSpec((C_pad, t_hw), out_map),
        ),
        compiler_params=pltpu.CompilerParams(
            dimension_semantics=("parallel", "arbitrary"),
            vmem_limit_bytes=vmem_limit),
        cost_estimate=cost,
    )(chunk_of, nch, pix_p, feats_s)


# ---------------------------------------------------------------------------
# Public wrapper (matches NeuralFeatMap.forward)
# ---------------------------------------------------------------------------
def neural_feat_map(H, W, pX, pY, vertMask, hatF, jInfo=None, *,
                    use_bf16=False, vertmask_bf16=None):
    """JAX/Pallas equivalent of NeuralFeatMap.forward.

    use_bf16:       cast vInfo / vertMask / feats to bf16 (f32 accumulation).
    vertmask_bf16:  stream only vertMask in bf16 (bit-exact iff vertMask is a
                    0/1 mask); defaults to use_bf16.
    Assumes unique (pY, pX) pixel coordinates; duplicates would be summed.
    """
    if vertmask_bf16 is None:
        vertmask_bf16 = use_bf16
    vInfo = hatF if jInfo is None else jnp.concatenate([hatF, jInfo], axis=0)
    C, V = vInfo.shape
    V2, P = vertMask.shape
    assert V == V2, "vertMask rows must match vInfo columns"
    HW = H * W
    vmem_limit = _vmem_limit_bytes()

    # ---- padding (multiples of 128 / 8 only) + tile selection -------------
    C_pad = _round_up(C, 8)
    V_pad = _round_up(V, 128)
    P_pad = _round_up(P, 128)
    HW_pad = _round_up(HW, 128)

    vinfo_dtype = jnp.bfloat16 if use_bf16 else jnp.float32
    mask_dtype = jnp.bfloat16 if (use_bf16 or vertmask_bf16) else jnp.float32

    # Stage-1 tiles: ~8 MiB of double-buffered vertMask per grid step.
    cap_k = 2048
    cap_p = 2048 if jnp.dtype(mask_dtype).itemsize == 2 else 1024
    tk = _choose_tile(V_pad, cap_k)
    tp = _split_for_parallel(P_pad, _choose_tile(P_pad, cap_p))
    n_k = V_pad // tk

    # ---- operand padding / layout ------------------------------------------
    # TODO(synk): cache the padded / bf16-cast vertMask across calls when it is
    # static for a sequence (it is by far the dominant HBM stream).
    vmask_p = _pad2(vertMask.astype(mask_dtype), V_pad, P_pad)
    vinfo_p = _pad2(vInfo.astype(vinfo_dtype), C_pad, V_pad)
    vinfo_3d = vinfo_p.reshape(C_pad, n_k, tk).transpose(1, 0, 2)  # (n_k,C_pad,tk)
    vinfo_resident = (C_pad * V_pad * jnp.dtype(vinfo_dtype).itemsize) <= (2 << 20)

    # ---- Stage 1: feats = vInfo @ vertMask on the MXU ----------------------
    feats = _feats_matmul(vinfo_3d, vmask_p, tk=tk, tp=tp,
                          vinfo_resident=vinfo_resident,
                          vmem_limit=vmem_limit)              # (C_pad, P_pad) f32

    # ---- Stage 2: windowed one-hot-matmul scatter --------------------------
    t_hw = _split_for_parallel(HW_pad, _choose_tile(HW_pad, 512))
    pc = _choose_tile(P_pad, 512)
    n_hw = HW_pad // t_hw
    n_chunks = P_pad // pc
    max_chunks = min(-(-t_hw // pc) + 1, n_chunks)            # static

    pix = (pY.astype(jnp.int32) * W + pX.astype(jnp.int32)).reshape(-1)   # (P,)
    order = jnp.argsort(pix)
    pix_s = pix[order]
    feats_v = feats[:, :P][:, order]                          # cheap (C x P) gather
    if use_bf16:
        feats_v = feats_v.astype(jnp.bfloat16)
    feats_s = _pad2(feats_v, C_pad, P_pad)
    pix_p = jnp.full((1, P_pad), HW_pad, jnp.int32).at[0, :P].set(pix_s)

    # Host-side window -> chunk bookkeeping for the scalar-prefetched index_map.
    bounds = jnp.arange(n_hw + 1, dtype=jnp.int32) * t_hw
    edge = jnp.searchsorted(pix_s, bounds, side="left").astype(jnp.int32)
    start, end = edge[:-1], edge[1:]
    has = end > start
    cs = jnp.where(has, start // pc, 0).astype(jnp.int32)
    nch = jnp.where(has, (end - 1) // pc - start // pc + 1, 0).astype(jnp.int32)
    chunk_of = jnp.minimum(
        cs[:, None] + jnp.arange(max_chunks, dtype=jnp.int32)[None, :],
        n_chunks - 1).reshape(-1).astype(jnp.int32)           # (n_hw*max_chunks,)

    out_flat = _scatter_windowed(chunk_of, nch, pix_p, feats_s,
                                 t_hw=t_hw, pc=pc, hw_pad=HW_pad,
                                 max_chunks=max_chunks, vmem_limit=vmem_limit)
    return out_flat[:C, :HW].reshape(C, H, W)


# ---------------------------------------------------------------------------
# Reference + self-test
# ---------------------------------------------------------------------------
def _reference(H, W, pX, pY, vertMask, hatF, jInfo=None):
    vInfo = hatF if jInfo is None else jnp.concatenate([hatF, jInfo], axis=0)
    feats = jnp.dot(vInfo, vertMask, precision=jax.lax.Precision.HIGHEST)
    out = jnp.zeros((vInfo.shape[0], H, W), jnp.float32)
    return out.at[:, pY, pX].set(feats)


if __name__ == "__main__":
    key = jax.random.PRNGKey(0)

    def make_case(k, H, W, V, P, C_f, C_j, binary_mask=False):
        k1, k2, k3, k4 = jax.random.split(k, 4)
        hatF = jax.random.normal(k1, (C_f, V), jnp.float32)
        jInfo = jax.random.normal(k2, (C_j, V), jnp.float32) if C_j else None
        if binary_mask:
            vertMask = (jax.random.uniform(k3, (V, P)) < 0.1).astype(jnp.float32)
        else:
            vertMask = jax.random.normal(k3, (V, P), jnp.float32)
        flat = jax.random.permutation(k4, H * W)[:P]          # unique pixels
        pY = (flat // W).astype(jnp.int32)
        pX = (flat % W).astype(jnp.int32)
        return H, W, pX, pY, vertMask, hatF, jInfo

    def check(case, name, **kw):
        H, W, pX, pY, vertMask, hatF, jInfo = case
        out = jax.block_until_ready(
            neural_feat_map(H, W, pX, pY, vertMask, hatF, jInfo, **kw))
        ref = _reference(H, W, pX, pY, vertMask, hatF, jInfo)
        assert out.shape == ref.shape, name
        assert jnp.allclose(out, ref, atol=2e-3, rtol=2e-3), f"mismatch ({name})"

    ks = jax.random.split(key, 5)

    # 1) demo-sized, with jInfo (first branch of the module).
    check(make_case(ks[0], 16, 16, 32, 16, 4, 4), "case1")
    # 2) non-aligned sizes, multi-tile HW grid.
    check(make_case(ks[1], 32, 32, 300, 150, 5, 3), "case2")
    # 3) jInfo=None branch, C not a multiple of 8.
    check(make_case(ks[2], 16, 16, 40, 20, 6, 0), "case3")
    # 4) multi-tile V reduction + multi-chunk scatter windows.
    check(make_case(ks[3], 32, 32, 2304, 600, 5, 3), "case4")
    # 5) binary vertMask streamed in bf16 (bit-exact fast path).
    check(make_case(ks[4], 16, 16, 64, 48, 7, 0, binary_mask=True),
          "case5_bf16mask", vertmask_bf16=True)

    print("KERNEL_OK")
</pallas_src>

<mosaic_0001>
module attributes {stable_mosaic.version = 11 : i64} {
  func.func @_feats_kernel(%arg0: i32, %arg1: i32, %arg2: memref<1x8x128xf32, #tpu.memory_space<vmem>>, %arg3: memref<128x128xf32, #tpu.memory_space<vmem>>, %arg4: memref<8x128xf32, #tpu.memory_space<vmem>>) attributes {dimension_semantics = [#tpu.dimension_semantics<parallel>, #tpu.dimension_semantics<arbitrary>], iteration_bounds = array<i64: 1, 1>, scalar_prefetch = 0 : i64, scratch_operands = 0 : i64, tpu.core_type = #tpu.core_type<tc>, window_params = [{pipeline_mode = #tpu.pipeline_mode<synchronous>, transform_indices = @transform_0, window_bounds = array<i64: 1, 8, 128>}, {transform_indices = @transform_1, window_bounds = array<i64: 128, 128>}, {transform_indices = @transform_2, window_bounds = array<i64: 8, 128>}]} {
    %c0_i32 = arith.constant 0 : i32
    %0 = arith.cmpi eq, %arg1, %c0_i32 : i32
    %1 = arith.extui %0 : i1 to i32
    %c0_i32_0 = arith.constant 0 : i32
    %2 = arith.cmpi ne, %1, %c0_i32_0 : i32
    scf.if %2 {
      %cst_8 = arith.constant 0.000000e+00 : f32
      %11 = vector.broadcast %cst_8 : f32 to vector<8x128xf32>
      %c0_9 = arith.constant 0 : index
      %c0_10 = arith.constant 0 : index
      %12 = vector.load %arg4[%c0_9, %c0_10] : memref<8x128xf32, #tpu.memory_space<vmem>>, vector<8x128xf32>
      tpu.vector_store %arg4[%c0_9, %c0_10], %11 {strides = array<i32>} : memref<8x128xf32, #tpu.memory_space<vmem>>, vector<8x128xf32>,
    } else {
    }
    %3 = arith.index_cast %arg1 : i32 to index
    %c0 = arith.constant 0 : index
    %c0_1 = arith.constant 0 : index
    %4 = vector.load %arg2[%3, %c0, %c0_1] : memref<1x8x128xf32, #tpu.memory_space<vmem>>, vector<1x8x128xf32>
    %5 = vector.shape_cast %4 : vector<1x8x128xf32> to vector<8x128xf32>
    %c0_2 = arith.constant 0 : index
    %c0_3 = arith.constant 0 : index
    %6 = vector.load %arg4[%c0_2, %c0_3] : memref<8x128xf32, #tpu.memory_space<vmem>>, vector<8x128xf32>
    %c0_4 = arith.constant 0 : index
    %c0_5 = arith.constant 0 : index
    %7 = vector.load %arg3[%c0_4, %c0_5] : memref<128x128xf32, #tpu.memory_space<vmem>>, vector<128x128xf32>
    %cst = arith.constant dense<0.000000e+00> : vector<8x128xf32>
    %8 = tpu.matmul %5, %7, %cst {dimension_numbers = #tpu.dot_dimension_numbers<[1], [0], [0], [1], [0, 0, 1, 1], [], []>} : vector<8x128xf32>, vector<128x128xf32>, vector<8x128xf32> -> vector<8x128xf32>
    %9 = arith.addf %6, %8 : vector<8x128xf32>
    %c0_6 = arith.constant 0 : index
    %c0_7 = arith.constant 0 : index
    %10 = vector.load %arg4[%c0_6, %c0_7] : memref<8x128xf32, #tpu.memory_space<vmem>>, vector<8x128xf32>
    tpu.vector_store %arg4[%c0_6, %c0_7], %9 {strides = array<i32>} : memref<8x128xf32, #tpu.memory_space<vmem>>, vector<8x128xf32>,
    return
  }
  func.func @transform_0(%arg0: i32, %arg1: i32) -> (i32, i32, i32) {
    %c0_i32 = arith.constant 0 : i32
    %c0_i32_0 = arith.constant 0 : i32
    %c0_i32_1 = arith.constant 0 : i32
    %c0_i32_2 = arith.constant 0 : i32
    return %c0_i32, %c0_i32_0, %c0_i32_1 : i32, i32, i32
  }
  func.func @transform_1(%arg0: i32, %arg1: i32) -> (i32, i32) {
    %c0_i32 = arith.constant 0 : i32
    return %arg1, %arg0 : i32, i32
  }
  func.func @transform_2(%arg0: i32, %arg1: i32) -> (i32, i32) {
    %c0_i32 = arith.constant 0 : i32
    %c0_i32_0 = arith.constant 0 : i32
    return %c0_i32, %arg0 : i32, i32
  }
}

</mosaic_0001>

<bundles_post_ra>
// kernel: tpu_custom_call.1
= control target key start
LH: loop header
LB: loop body
LE: loop exit
PB: predicated region body
PF: predicated region fallthrough
CT: control target
= control target key end

     0   :  { %7 = vsyncpa [#allocation3], 0  ;;  %s220_s0 = inlined_call_operand.hbm [shape: f32[1,8,128], index: 0, kind: input, shape index: {}]   ;;  %s221_s1 = inlined_call_operand.hbm [shape: f32[128,128], index: 1, kind: input, shape index: {}]   ;;  %s222_s2 = inlined_call_operand.hbm [shape: f32[8,128], index: 2, kind: output, shape index: {}]  }
   0x1   :  { %8 = vsyncpa [#allocation6], 0 }
   0x2   :  { %9 = vsyncpa [#allocation4], 0  ;;  %s15_s11 = sshll.u32 %s220_s0, 4  ;;  %s191_s12 = smov [#allocation2]   ;;  %s16_s11 = int_to_ptr.hbm [resolvable:$true] %s15_s11 }
   0x3   :  { %s17_s13 = sshll.u32 %s191_s12, 4  ;;  %s25_s16 = sshll.u32 %s221_s1, 4  ;;  %s18_s13 = int_to_ptr.vmem [resolvable:$true] %s17_s13  ;;  %s26_s16 = int_to_ptr.hbm [resolvable:$true] %s25_s16 }
   0x4   :  { %20 = dma.hbm_to_vmem [thread:$0]  %s16_s11, 128, %s18_s13, [#allocation3]  }
   0x5   :  { %s192_s17 = smov [#allocation5]   ;;  %s193_s19 = smov 128  }
   0x6   :  { %s27_s18 = sshll.u32 %s192_s17, 4  ;;  %s194_s20 = smov 8   ;;  %s28_s18 = int_to_ptr.vmem [resolvable:$true] %s27_s18 }
   0x7   :  { %33 = dma.hbm_to_vmem [thread:$0]  %s26_s16, 2048, %s28_s18, [#allocation6], %s193_s19, %s193_s19, %s194_s20  }
   0x8   :  { %185 = dma.done.wait [#allocation3], 128  }
   0x9   :  { %186 = vsyncadd [#allocation3], 4294967168 }
   0xa   :  { %187 = dma.done.wait [#allocation6], 2048  }
   0xb   :  { %188 = vsyncadd [#allocation6], 4294965248  ;;  %v66_v0 = vld [vmem:[#allocation5 + $0x78] sm:$0xff]  ;;  %v65_v1 = vld [vmem:[#allocation5 + $0x70] sm:$0xff]  ;;  %s195_s0 = smov [#allocation7]   ;;  %s96_s23 = sshll.u32 %s222_s2, 4  ;;  %s97_s23 = int_to_ptr.hbm [resolvable:$true] %s96_s23 }
   0xc   :  { %67 = vmatpush.msra.mxu0 %v66_v0  ;;  %v64_v2 = vld [vmem:[#allocation5 + $0x68] sm:$0xff]  ;;  %v63_v3 = vld [vmem:[#allocation5 + $0x60] sm:$0xff]  ;;  %v62_v4 = vld [vmem:[#allocation5 + $0x58] sm:$0xff]  ;;  %s94_s1 = sshll.u32 %s195_s0, 4  ;;  %s95_s1 = int_to_ptr.vmem [resolvable:$true] %s94_s1 }
   0xd   :  { %v61_v5 = vld [vmem:[#allocation5 + $0x50] sm:$0xff]  ;;  %v60_v6 = vld [vmem:[#allocation5 + $0x48] sm:$0xff]  ;;  %v59_v7 = vld [vmem:[#allocation5 + $0x40] sm:$0xff] }
   0xe   :  { %68 = vmatpush.msra.mxu0 %v65_v1  ;;  %v58_v8 = vld [vmem:[#allocation5 + $0x38] sm:$0xff]  ;;  %v57_v9 = vld [vmem:[#allocation5 + $0x30] sm:$0xff]  ;;  %v56_v10 = vld [vmem:[#allocation5 + $0x28] sm:$0xff] }
   0xf   :  { %v55_v11 = vld [vmem:[#allocation5 + $0x20] sm:$0xff]  ;;  %v54_v12 = vld [vmem:[#allocation5 + $0x18] sm:$0xff]  ;;  %v53_v13 = vld [vmem:[#allocation5 + $0x10] sm:$0xff] }
  0x10   :  { %69 = vmatpush.msra.mxu0 %v64_v2  ;;  %v52_v14 = vld [vmem:[#allocation5 + $0x8] sm:$0xff]  ;;  %v51_v15 = vld [vmem:[#allocation5] sm:$0xff]  ;;  %v49_v16 = vld [vmem:[#allocation2] sm:$0xff] }
  0x12   :  { %70 = vmatpush.msra.mxu0 %v63_v3 }
  0x14   :  { %71 = vmatpush.msra.mxu0 %v62_v4 }
  0x16   :  { %72 = vmatpush.msra.mxu0 %v61_v5 }
  0x18   :  { %73 = vmatpush.msra.mxu0 %v60_v6 }
  0x1a   :  { %74 = vmatpush.msra.mxu0 %v59_v7 }
  0x1c   :  { %75 = vmatpush.msra.mxu0 %v58_v8 }
  0x1e   :  { %76 = vmatpush.msra.mxu0 %v57_v9 }
  0x20   :  { %77 = vmatpush.msra.mxu0 %v56_v10 }
  0x22   :  { %78 = vmatpush.msra.mxu0 %v55_v11 }
  0x24   :  { %79 = vmatpush.msra.mxu0 %v54_v12 }
  0x26   :  { %80 = vmatpush.msra.mxu0 %v53_v13 }
  0x28   :  { %81 = vmatpush.msra.mxu0 %v52_v14 }
  0x2a   :  { %82 = vmatpush.msra.mxu0 %v51_v15 }
  0x2b   :  { %83 = vmatmul.f32.vlgmr.msra.gmra.mxu0 %v49_v16 }
  0xa8   :  { %v84_v17 = vpop.f32.mrf.mxu0 }
  0xa9   :  { %88 = vst [vmem:[#allocation7] sm:$0xff] %v84_v17 }
  0xaa   :  { %99 = dma.vmem_to_hbm [thread:$0]  %s95_s1, 128, %s97_s23, [#allocation4]  }
  0xab   :  { %189 = dma.done.wait [#allocation4], 128  }
  0xac   :  { %190 = vsyncadd [#allocation4], 4294967168 }
  0xad   :  { %104 = vsyncpa [#allocation3], 1 }
  0xae   :  { %105 = vsyncpa [#allocation6], 1 }
  0xaf   :  { %106 = vsyncpa [#allocation4], 1 }

</bundles_post_ra>
